<compile_context>
chip_gen: v7x
topology: tpu7x:2x2x1
jax: 0.10.0
libtpu: 0.0.40
codegen_flags: <defaults>
</compile_context>

<pallas_src>
import jax
import jax.numpy as jnp
from jax.experimental import pallas as pl
from jax.experimental.pallas import tpu as pltpu


def _round_up(x, m):
    return (x + m - 1) // m * m


def _proj_kernel(x_ref, w_ref, b_ref, o_ref):
    # x_ref: (tm, K) bf16, w_ref: (K, Ep) bf16, b_ref: (1, Ep) f32, o_ref: (tm, Ep)
    acc = jnp.dot(x_ref[...], w_ref[...], preferred_element_type=jnp.float32)
    o_ref[...] = (acc + b_ref[...]).astype(o_ref.dtype)


def _patch_proj(patches, weight_2d, bias, *, out_dtype, tm=512):
    """patches: (N, K), weight_2d: (K, E), bias: (E,) -> (N, E) in out_dtype."""
    N, K = patches.shape
    E = weight_2d.shape[1]

    # Lane-dense output: pad E up to a multiple of 128 (unmasked vector stores).
    Ep = _round_up(E, 128)
    if Ep != E:
        weight_2d = jnp.pad(weight_2d, ((0, 0), (0, Ep - E)))
        bias = jnp.pad(bias, (0, Ep - E))
    bias2d = bias.reshape(1, Ep).astype(jnp.float32)

    # No N padding: cdiv grid, last partial block is clipped by Pallas.
    # tm must be a multiple of 8 unless it equals the full N (min() guarantees
    # a valid block either way and keeps a single tiny block for small tests).
    tm_eff = min(tm, N)
    grid = (pl.cdiv(N, tm_eff),)

    cost = pl.CostEstimate(
        flops=2 * N * K * E,
        transcendentals=0,
        bytes_accessed=(N * K * patches.dtype.itemsize
                        + K * Ep * weight_2d.dtype.itemsize
                        + N * Ep * jnp.dtype(out_dtype).itemsize),
    )

    out = pl.pallas_call(
        _proj_kernel,
        out_shape=jax.ShapeDtypeStruct((N, Ep), out_dtype),
        grid_spec=pltpu.PrefetchScalarGridSpec(
            num_scalar_prefetch=0,
            grid=grid,
            in_specs=[
                pl.BlockSpec((tm_eff, K), lambda i: (i, 0)),   # patch tile
                pl.BlockSpec((K, Ep), lambda i: (0, 0)),       # resident weight
                pl.BlockSpec((1, Ep), lambda i: (0, 0)),       # resident bias
            ],
            out_specs=pl.BlockSpec((tm_eff, Ep), lambda i: (i, 0)),
        ),
        compiler_params=pltpu.CompilerParams(
            dimension_semantics=("parallel",),
            # Allow XLA to fuse the patchify transpose/convert (and the tiny
            # weight/bias reshapes) into the pallas input stream.
            allow_input_fusion=[True, True, True],
        ),
        cost_estimate=cost,
    )(patches, weight_2d, bias2d)

    if Ep != E:
        out = out[:, :E]
    return out


class PatchEmbed3D:
    """JAX/Pallas re-implementation of OpenDiT's PatchEmbed3D (norm_layer=None)."""

    def __init__(self, patch_size=(2, 4, 4), in_chans=3, embed_dim=96,
                 flatten=True, key=None, dtype=jnp.float32,
                 compute_dtype=jnp.bfloat16, out_dtype=None, tm=512):
        self.patch_size = patch_size
        self.in_chans = in_chans
        self.embed_dim = embed_dim
        self.flatten = flatten
        self.compute_dtype = compute_dtype   # bf16 MXU inputs, f32 accumulate
        self.out_dtype = out_dtype           # None -> match input dtype; set bf16 if consumer allows
        self.tm = tm                         # M tile; sweep 512-1024 per chip
        # TODO(synk): norm_layer path not implemented (module default is None).

        if key is None:
            key = jax.random.PRNGKey(0)
        kw, kb = jax.random.split(key)
        pd, ph, pw = patch_size
        fan_in = in_chans * pd * ph * pw
        bound = 1.0 / (fan_in ** 0.5)
        # Conv3d weight layout: (E, C, pd, ph, pw), bias: (E,)
        self.weight = jax.random.uniform(
            kw, (embed_dim, in_chans, pd, ph, pw), dtype, -bound, bound)
        self.bias = jax.random.uniform(kb, (embed_dim,), dtype, -bound, bound)

    def __call__(self, x):
        # x: (B, C, D, H, W)
        B, C, D, H, W = x.shape
        pd, ph, pw = self.patch_size

        # Pad trailing side of W, H, D (matches F.pad in the PyTorch forward).
        pad_w, pad_h, pad_d = (-W) % pw, (-H) % ph, (-D) % pd
        if pad_w or pad_h or pad_d:
            x = jnp.pad(x, ((0, 0), (0, 0), (0, pad_d), (0, pad_h), (0, pad_w)))
        Dp, Hp, Wp = (D + pad_d) // pd, (H + pad_h) // ph, (W + pad_w) // pw

        # Patchify: (B,C,Dp,pd,Hp,ph,Wp,pw) -> (B,Dp,Hp,Wp,C,pd,ph,pw).
        # transpose + reshape + bf16 convert fuse into one XLA copy, so the
        # materialized patch matrix is bf16 (half the HBM bytes of f32).
        xp = x.reshape(B, C, Dp, pd, Hp, ph, Wp, pw)
        xp = jnp.transpose(xp, (0, 2, 4, 6, 1, 3, 5, 7))
        K = C * pd * ph * pw
        N = B * Dp * Hp * Wp
        patches = xp.reshape(N, K).astype(self.compute_dtype)

        # Weight (E, C, pd, ph, pw) -> (K, E); flatten order matches patches.
        w2d = self.weight.reshape(self.embed_dim, K).T.astype(self.compute_dtype)

        out_dtype = self.out_dtype or x.dtype
        out = _patch_proj(patches, w2d, self.bias, out_dtype=out_dtype, tm=self.tm)
        out = out.reshape(B, Dp * Hp * Wp, self.embed_dim)   # flatten(2).transpose(1,2)

        if not self.flatten:
            out = out.reshape(B, Dp, Hp, Wp, self.embed_dim)
            out = jnp.transpose(out, (0, 4, 1, 2, 3))          # (B, E, Dp, Hp, Wp)
        return out


def _reference(x, weight, bias, patch_size):
    """Pure-JAX reference via lax.conv_general_dilated (NCDHW)."""
    pd, ph, pw = patch_size
    _, _, D, H, W = x.shape
    x = jnp.pad(x, ((0, 0), (0, 0),
                    (0, (-D) % pd), (0, (-H) % ph), (0, (-W) % pw)))
    y = jax.lax.conv_general_dilated(
        x, weight, window_strides=patch_size, padding="VALID",
        dimension_numbers=("NCDHW", "OIDHW", "NCDHW"),
        precision=jax.lax.Precision.HIGHEST)
    y = y + bias.reshape(1, -1, 1, 1, 1)
    B, E, Dp, Hp, Wp = y.shape
    return jnp.transpose(y.reshape(B, E, Dp * Hp * Wp), (0, 2, 1))


if __name__ == "__main__":
    key = jax.random.PRNGKey(0)
    k_in, k_mod, k_in2, k_mod2 = jax.random.split(key, 4)

    # --- Test 1: B=2, C=4, D=4, H=W=16; E=32 exercises the E->128 pad path. ---
    B, C, D, H, W = 2, 4, 4, 16, 16
    patch_size = (2, 4, 4)
    embed_dim = 32

    x = jax.random.normal(k_in, (B, C, D, H, W), jnp.float32)
    mod = PatchEmbed3D(patch_size=patch_size, in_chans=C,
                       embed_dim=embed_dim, key=k_mod)

    out = jax.block_until_ready(jax.jit(mod.__call__)(x))
    assert out.shape == (B, (D // 2) * (H // 4) * (W // 4), embed_dim), out.shape

    # Tight check of the kernel math: reference fed bf16-rounded inputs.
    ref_exact = _reference(x.astype(jnp.bfloat16).astype(jnp.float32),
                           mod.weight.astype(jnp.bfloat16).astype(jnp.float32),
                           mod.bias, patch_size)
    assert jnp.allclose(out, ref_exact, atol=1e-4, rtol=1e-4), \
        float(jnp.max(jnp.abs(out - ref_exact)))
    # Loose check against the full f32 conv (bounds bf16 quantization error).
    ref_full = _reference(x, mod.weight, mod.bias, patch_size)
    assert jnp.allclose(out, ref_full, atol=5e-2, rtol=5e-2), \
        float(jnp.max(jnp.abs(out - ref_full)))

    # --- Test 2: uneven spatial dims + partial last grid block + default E=96. ---
    B2, C2, D2, H2, W2 = 1, 4, 3, 10, 10        # pads to D=4, H=12, W=12; N=18
    x2 = jax.random.normal(k_in2, (B2, C2, D2, H2, W2), jnp.float32)
    mod2 = PatchEmbed3D(patch_size=patch_size, in_chans=C2,
                        embed_dim=96, key=k_mod2, tm=8)   # tm=8 -> grid=3, last block partial
    out2 = jax.block_until_ready(jax.jit(mod2.__call__)(x2))
    assert out2.shape == (B2, 2 * 3 * 3, 96), out2.shape
    ref2 = _reference(x2.astype(jnp.bfloat16).astype(jnp.float32),
                      mod2.weight.astype(jnp.bfloat16).astype(jnp.float32),
                      mod2.bias, patch_size)
    assert jnp.allclose(out2, ref2, atol=1e-4, rtol=1e-4), \
        float(jnp.max(jnp.abs(out2 - ref2)))

    print("KERNEL_OK")
</pallas_src>

<mosaic_0001>
module attributes {stable_mosaic.version = 11 : i64} {
  func.func @_proj_kernel(%arg0: i32, %arg1: memref<64x128xbf16, #tpu.memory_space<vmem>>, %arg2: memref<128x128xbf16, #tpu.memory_space<vmem>>, %arg3: memref<1x128xf32, #tpu.memory_space<vmem>>, %arg4: memref<64x128xf32, #tpu.memory_space<vmem>>) attributes {dimension_semantics = [#tpu.dimension_semantics<parallel>], iteration_bounds = array<i64: 1>, scalar_prefetch = 0 : i64, scratch_operands = 0 : i64, tpu.core_type = #tpu.core_type<tc>, window_params = [{transform_indices = @transform_0, window_bounds = array<i64: 64, 128>}, {pipeline_mode = #tpu.pipeline_mode<synchronous>, transform_indices = @transform_1, window_bounds = array<i64: 128, 128>}, {pipeline_mode = #tpu.pipeline_mode<synchronous>, transform_indices = @transform_2, window_bounds = array<i64: 1, 128>}, {transform_indices = @transform_3, window_bounds = array<i64: 64, 128>}]} {
    %c0 = arith.constant 0 : index
    %c0_0 = arith.constant 0 : index
    %0 = vector.load %arg1[%c0, %c0_0] : memref<64x128xbf16, #tpu.memory_space<vmem>>, vector<64x128xbf16>
    %c0_1 = arith.constant 0 : index
    %c0_2 = arith.constant 0 : index
    %1 = vector.load %arg2[%c0_1, %c0_2] : memref<128x128xbf16, #tpu.memory_space<vmem>>, vector<128x128xbf16>
    %cst = arith.constant dense<0.000000e+00> : vector<64x128xf32>
    %2 = tpu.matmul %0, %1, %cst {dimension_numbers = #tpu.dot_dimension_numbers<[1], [0], [0], [1], [0, 0, 1, 1], [], []>} : vector<64x128xbf16>, vector<128x128xbf16>, vector<64x128xf32> -> vector<64x128xf32>
    %c0_3 = arith.constant 0 : index
    %c0_4 = arith.constant 0 : index
    %3 = vector.load %arg3[%c0_3, %c0_4] : memref<1x128xf32, #tpu.memory_space<vmem>>, vector<1x128xf32>
    %4 = vector.broadcast %3 : vector<1x128xf32> to vector<64x128xf32>
    %5 = arith.addf %2, %4 : vector<64x128xf32>
    %c0_5 = arith.constant 0 : index
    %c0_6 = arith.constant 0 : index
    %6 = vector.load %arg4[%c0_5, %c0_6] : memref<64x128xf32, #tpu.memory_space<vmem>>, vector<64x128xf32>
    tpu.vector_store %arg4[%c0_5, %c0_6], %5 {strides = array<i32>} : memref<64x128xf32, #tpu.memory_space<vmem>>, vector<64x128xf32>,
    return
  }
  func.func @transform_0(%arg0: i32) -> (i32, i32) {
    %c0_i32 = arith.constant 0 : i32
    %c0_i32_0 = arith.constant 0 : i32
    return %arg0, %c0_i32 : i32, i32
  }
  func.func @transform_1(%arg0: i32) -> (i32, i32) {
    %c0_i32 = arith.constant 0 : i32
    %c0_i32_0 = arith.constant 0 : i32
    %c0_i32_1 = arith.constant 0 : i32
    return %c0_i32, %c0_i32_0 : i32, i32
  }
  func.func @transform_2(%arg0: i32) -> (i32, i32) {
    %c0_i32 = arith.constant 0 : i32
    %c0_i32_0 = arith.constant 0 : i32
    %c0_i32_1 = arith.constant 0 : i32
    return %c0_i32, %c0_i32_0 : i32, i32
  }
  func.func @transform_3(%arg0: i32) -> (i32, i32) {
    %c0_i32 = arith.constant 0 : i32
    %c0_i32_0 = arith.constant 0 : i32
    return %arg0, %c0_i32 : i32, i32
  }
}

</mosaic_0001>

<bundles_post_ra>
// kernel: a_call__.1
= control target key start
LH: loop header
LB: loop body
LE: loop exit
PB: predicated region body
PF: predicated region fallthrough
CT: control target
= control target key end

     0   :  { %s386_s0 = inlined_call_operand.vmem [shape: bf16[64,128], index: 0, kind: input, shape index: {}]   ;;  %s387_s1 = inlined_call_operand.vmem [shape: bf16[128,128], index: 1, kind: input, shape index: {}]   ;;  %s388_s2 = inlined_call_operand.vmem [shape: f32[1,128], index: 2, kind: input, shape index: {}]   ;;  %s389_s3 = inlined_call_operand.hbm [shape: f32[64,128], index: 3, kind: output, shape index: {}]  }
   0x1   :  { %v276_v0 = vld [vmem:[%s387_s1] sm:$0xff]   ;;  %v277_v1 = vld [vmem:[%s387_s1 + $0x8] sm:$0xff]   ;;  %v278_v2 = vld [vmem:[%s387_s1 + $0x10] sm:$0xff]  }
   0x2   :  { %233 = vmatprep.subr.bf16.mxu0 %v276_v0  ;;  %257 = vmatprep.subr.bf16.mxu1 %v276_v0  ;;  %v279_v3 = vld [vmem:[%s387_s1 + $0x18] sm:$0xff]   ;;  %v284_v4 = vld [vmem:[%s386_s0] sm:$0xff]   ;;  %v285_v5 = vld [vmem:[%s386_s0 + $0x10] sm:$0xff]  }
   0x3   :  { %234 = vmatpush3.bf16.msra.mxu0 %v276_v0  ;;  %265 = vmatpush3.bf16.msra.mxu1 %v276_v0  ;;  %v280_v6 = vld [vmem:[%s387_s1 + $0x20] sm:$0xff]  }
   0x4   :  { %235 = vmatprep.subr.bf16.mxu0 %v277_v1  ;;  %258 = vmatprep.subr.bf16.mxu1 %v277_v1 }
   0x5   :  { %249 = vmatprep.mubr.bf16.mxu0 %v284_v4 }
   0x7   :  { %236 = vmatpush3.bf16.msra.mxu0 %v277_v1  ;;  %266 = vmatpush3.bf16.msra.mxu1 %v277_v1 }
   0x8   :  { %237 = vmatprep.subr.bf16.mxu0 %v278_v2  ;;  %259 = vmatprep.subr.bf16.mxu1 %v278_v2 }
   0xb   :  { %238 = vmatpush3.bf16.msra.mxu0 %v278_v2  ;;  %267 = vmatpush3.bf16.msra.mxu1 %v278_v2 }
   0xc   :  { %239 = vmatprep.subr.bf16.mxu0 %v279_v3  ;;  %260 = vmatprep.subr.bf16.mxu1 %v279_v3 }
   0xd   :  { %8 = vsyncpa [#allocation3], 0  ;;  %253 = vmatprep.mubr.bf16.mxu1 %v285_v5  ;;  %v281_v7 = vld [vmem:[%s387_s1 + $0x28] sm:$0xff]   ;;  %v282_v8 = vld [vmem:[%s387_s1 + $0x30] sm:$0xff]  }
   0xe   :  { %v283_v9 = vld [vmem:[%s387_s1 + $0x38] sm:$0xff]   ;;  %v286_v10 = vld [vmem:[%s386_s0 + $0x8] sm:$0xff]   ;;  %v208_v12 = vld [vmem:[%s388_s2] ss:$0 sm:$0xff]  ;;  %s312_s1 = smov [#allocation2]  }
   0xf   :  { %240 = vmatpush3.bf16.msra.mxu0 %v279_v3  ;;  %268 = vmatpush3.bf16.msra.mxu1 %v279_v3  ;;  %v287_v11 = vld [vmem:[%s386_s0 + $0x18] sm:$0xff]   ;;  %s197_s11 = sshll.u32 %s312_s1, 4  ;;  %s198_s11 = int_to_ptr.vmem [resolvable:$true] %s197_s11 }
  0x10   :  { %241 = vmatprep.subr.bf16.mxu0 %v280_v6  ;;  %261 = vmatprep.subr.bf16.mxu1 %v280_v6  ;;  %s288_s0 = scalar_lea.vmem %s198_s11, 1024  ;;  %p293_p1 = scmp.lt.s32.totalorder %s198_s11, %s198_s11 }
  0x11   :  { %p289_p0 = scmp.ne.s32.totalorder %s198_s11, %s288_s0  ;;  %p294_p2 = scmp.lt.s32.totalorder %s288_s0, %s288_s0 }
  0x13   :  { %242 = vmatpush3.bf16.msra.mxu0 %v280_v6  ;;  %269 = vmatpush3.bf16.msra.mxu1 %v280_v6  ;;  %p295_p3 = por %p294_p2, %p293_p1 }
  0x14   :  { %243 = vmatprep.subr.bf16.mxu0 %v281_v7  ;;  %262 = vmatprep.subr.bf16.mxu1 %v281_v7 }
  0x15   :  { %p296_p4 = pnand %p295_p3, %p289_p0 }
  0x17   :  { %244 = vmatpush3.bf16.msra.mxu0 %v281_v7  ;;  %270 = vmatpush3.bf16.msra.mxu1 %v281_v7 }
  0x18   :  { %245 = vmatprep.subr.bf16.mxu0 %v282_v8  ;;  %263 = vmatprep.subr.bf16.mxu1 %v282_v8 }
  0x1b   :  { %246 = vmatpush3.bf16.msra.mxu0 %v282_v8  ;;  %271 = vmatpush3.bf16.msra.mxu1 %v282_v8 }
  0x1c   :  { %247 = vmatprep.subr.bf16.mxu0 %v283_v9  ;;  %264 = vmatprep.subr.bf16.mxu1 %v283_v9 }
  0x1f   :  { %248 = vmatpush3.bf16.msra.mxu0 %v283_v9  ;;  %272 = vmatpush3.bf16.msra.mxu1 %v283_v9 }
  0x22   :  { %250 = vmatmul.mubr.bf16.vlgmr.msra.gmra.mrb[0].mxu0 %v286_v10  ;;  %254 = vmatmul.mubr.bf16.vlgmr.msra.gmra.mrb[0].mxu1 %v287_v11 }
  0xf5   :  { %v251_v13 = vpop.f32.mrb[0].mxu0  ;;  %v255_v14 = vpop.f32.mrb[0].mxu1 }
  0xf6   :  { %v162_v15 = vadd.f32 %v251_v13, %v208_v12  ;;  %v178_v16 = vadd.f32 %v255_v14, %v208_v12  ;;  %v153_v17 = vpop.f32.mrb[1].mxu0  ;;  %v169_v18 = vpop.f32.mrb[1].mxu1 }
  0xf7   :  { %v154_v19 = vadd.f32 %v208_v12, %v153_v17  ;;  %v170_v20 = vadd.f32 %v208_v12, %v169_v18  ;;  %v252_v21 = vpop.f32.mrb[2].mxu0  ;;  %v256_v22 = vpop.f32.mrb[2].mxu1 }
  0xf8   :  { %186 = vst [vmem:[#allocation2 + $0x10] sm:$0xff] %v162_v15  ;;  %190 = vst [vmem:[#allocation2 + $0x30] sm:$0xff] %v178_v16  ;;  %v165_v23 = vadd.f32 %v252_v21, %v208_v12  ;;  %v181_v24 = vadd.f32 %v256_v22, %v208_v12  ;;  %v156_v25 = vpop.f32.mrb[3].mxu0  ;;  %v172_v26 = vpop.f32.mrb[3].mxu1 }
  0xf9   :  { %184 = vst [vmem:[#allocation2] sm:$0xff] %v154_v19  ;;  %188 = vst [vmem:[#allocation2 + $0x20] sm:$0xff] %v170_v20  ;;  %v157_v27 = vadd.f32 %v208_v12, %v156_v25  ;;  %v173_v28 = vadd.f32 %v208_v12, %v172_v26 }
  0xfa   :  { %187 = vst [vmem:[#allocation2 + $0x18] sm:$0xff] %v165_v23  ;;  %191 = vst [vmem:[#allocation2 + $0x38] sm:$0xff] %v181_v24 }
  0xfb   :  { %185 = vst [vmem:[#allocation2 + $0x8] sm:$0xff] %v157_v27  ;;  %189 = vst [vmem:[#allocation2 + $0x28] sm:$0xff] %v173_v28 }
  0xfc   :  { %299 = shalt.err (!%p296_p4)
}
  0xfd   :  { %s300_s13 = scalar_lea.hbm %s389_s3, 1024 }
  0xfe   :  { %p301_p5 = scmp.ne.s32.totalorder %s389_s3, %s300_s13  ;;  %p304_p6 = scmp.lt.u32.totalorder %s300_s13, %s389_s3 }
 0x100   :  { %p306_p7 = pnand %p304_p6, %p301_p5 }
 0x102   :  { %309 = shalt.err (!%p306_p7)
}
 0x103   :  { %s313_s18 = smov 128   ;;  %s314_s19 = smov 8  }
 0x104   :  { %203 = dma.vmem_to_hbm [thread:$0]  %s198_s11, 1024, %s389_s3, [#allocation3], %s313_s18, %s313_s18, %s314_s19  }
 0x105   :  { %310 = dma.done.wait [#allocation3], 1024  }
 0x106   :  { %311 = vsyncadd [#allocation3], 4294966272 }
 0x107   :  { %207 = vsyncpa [#allocation3], 1 }

</bundles_post_ra>
